<compile_context>
chip_gen: v7x
topology: tpu7x:2x2x1
jax: 0.10.0
libtpu: 0.0.40
codegen_flags: <defaults>
</compile_context>

<pallas_src>
import functools
import math

import jax
import jax.numpy as jnp
from jax.experimental import pallas as pl
from jax.experimental.pallas import tpu as pltpu

# ----------------------------------------------------------------------------
# Config (set BASE=320, D_CONTEXT=768 for the full-size Stable-Diffusion UNet)
# ----------------------------------------------------------------------------
BASE = 32          # original: 320
N_HEADS = 8
D_TIME = 4 * BASE  # original: 1280
D_CONTEXT = 64     # original: 768
N_GROUPS = 32

# Tile caps (safe for v5e/v6e/v7x VMEM budgets; bf16 operands keep tiles ~0.5 MB).
TM, TN, TK = 256, 256, 512
VMEM_LIMIT = 32 * 1024 * 1024


def _round_up(x, m):
    return ((x + m - 1) // m) * m


def _pad2(x, rows, cols):
    pr, pc = rows - x.shape[0], cols - x.shape[1]
    if pr == 0 and pc == 0:
        return x
    return jnp.pad(x, ((0, pr), (0, pc)))


def _pad_rows3(x, rows):
    pr = rows - x.shape[1]
    if pr == 0:
        return x
    return jnp.pad(x, ((0, 0), (0, pr), (0, 0)))


# ----------------------------------------------------------------------------
# Tiled matmul kernel (bf16 MXU, f32 accumulator, fused bias / residual epilogue)
# ----------------------------------------------------------------------------
def _matmul_kernel(a_ref, w_ref, *rest, has_bias, has_res):
    o_ref, acc_ref = rest[-2], rest[-1]
    extra = rest[:-2]
    idx = 0
    b_ref = None
    r_ref = None
    if has_bias:
        b_ref = extra[idx]
        idx += 1
    if has_res:
        r_ref = extra[idx]
        idx += 1

    k = pl.program_id(2)

    @pl.when(k == 0)
    def _():
        acc_ref[...] = jnp.zeros_like(acc_ref)

    acc_ref[...] += jnp.dot(a_ref[...].astype(jnp.bfloat16),
                            w_ref[...].astype(jnp.bfloat16),
                            preferred_element_type=jnp.float32)

    @pl.when(k == pl.num_programs(2) - 1)
    def _():
        y = acc_ref[...]
        if has_bias:
            y = y + b_ref[...]
        if has_res:
            y = y + r_ref[...]
        o_ref[...] = y.astype(o_ref.dtype)


@jax.jit
def matmul_bias(a, w, b=None, residual=None):
    """(M,K) @ (K,N) [+ bias] [+ residual], tiled/pipelined on the MXU."""
    M, K = a.shape
    N = w.shape[1]
    tm = min(TM, _round_up(M, 8))
    tn = min(TN, _round_up(N, 128))
    tk = min(TK, _round_up(K, 128))
    Mp, Kp, Np = _round_up(M, tm), _round_up(K, tk), _round_up(N, tn)

    operands = [_pad2(a, Mp, Kp), _pad2(w, Kp, Np)]
    in_specs = [pl.BlockSpec((tm, tk), lambda i, j, k: (i, k)),
                pl.BlockSpec((tk, tn), lambda i, j, k: (k, j))]
    has_bias = b is not None
    has_res = residual is not None
    if has_bias:
        operands.append(_pad2(b.reshape(1, N).astype(jnp.float32), 1, Np))
        in_specs.append(pl.BlockSpec((1, tn), lambda i, j, k: (0, j)))
    if has_res:
        operands.append(_pad2(residual, Mp, Np))
        in_specs.append(pl.BlockSpec((tm, tn), lambda i, j, k: (i, j)))

    out = pl.pallas_call(
        functools.partial(_matmul_kernel, has_bias=has_bias, has_res=has_res),
        out_shape=jax.ShapeDtypeStruct((Mp, Np), jnp.float32),
        grid=(Mp // tm, Np // tn, Kp // tk),
        in_specs=in_specs,
        out_specs=pl.BlockSpec((tm, tn), lambda i, j, k: (i, j)),
        scratch_shapes=[pltpu.VMEM((tm, tn), jnp.float32)],
        compiler_params=pltpu.CompilerParams(
            dimension_semantics=("parallel", "parallel", "arbitrary"),
            vmem_limit_bytes=VMEM_LIMIT),
    )(*operands)
    if Mp != M or Np != N:
        out = out[:M, :N]
    return out


# ----------------------------------------------------------------------------
# Fused GEGLU matmul:  out = (a@Wa + ba) * gelu(a@Wg + bg)
# ----------------------------------------------------------------------------
def _matmul_geglu_kernel(a_ref, wa_ref, ba_ref, wg_ref, bg_ref, o_ref, acc_a, acc_g):
    k = pl.program_id(2)

    @pl.when(k == 0)
    def _():
        acc_a[...] = jnp.zeros_like(acc_a)
        acc_g[...] = jnp.zeros_like(acc_g)

    a = a_ref[...].astype(jnp.bfloat16)
    acc_a[...] += jnp.dot(a, wa_ref[...].astype(jnp.bfloat16),
                          preferred_element_type=jnp.float32)
    acc_g[...] += jnp.dot(a, wg_ref[...].astype(jnp.bfloat16),
                          preferred_element_type=jnp.float32)

    @pl.when(k == pl.num_programs(2) - 1)
    def _():
        val = acc_a[...] + ba_ref[...]
        gate = acc_g[...] + bg_ref[...]
        gelu = 0.5 * gate * (1.0 + jax.lax.erf(gate * (1.0 / math.sqrt(2.0))))  # exact GELU
        o_ref[...] = (val * gelu).astype(o_ref.dtype)


@jax.jit
def matmul_geglu(a, wa, ba, wg, bg):
    M, K = a.shape
    N = wa.shape[1]
    tm = min(TM, _round_up(M, 8))
    tn = min(TN, _round_up(N, 128))
    tk = min(TK, _round_up(K, 128))
    Mp, Kp, Np = _round_up(M, tm), _round_up(K, tk), _round_up(N, tn)

    out = pl.pallas_call(
        _matmul_geglu_kernel,
        out_shape=jax.ShapeDtypeStruct((Mp, Np), jnp.float32),
        grid=(Mp // tm, Np // tn, Kp // tk),
        in_specs=[pl.BlockSpec((tm, tk), lambda i, j, k: (i, k)),
                  pl.BlockSpec((tk, tn), lambda i, j, k: (k, j)),
                  pl.BlockSpec((1, tn), lambda i, j, k: (0, j)),
                  pl.BlockSpec((tk, tn), lambda i, j, k: (k, j)),
                  pl.BlockSpec((1, tn), lambda i, j, k: (0, j))],
        out_specs=pl.BlockSpec((tm, tn), lambda i, j, k: (i, j)),
        scratch_shapes=[pltpu.VMEM((tm, tn), jnp.float32),
                        pltpu.VMEM((tm, tn), jnp.float32)],
        compiler_params=pltpu.CompilerParams(
            dimension_semantics=("parallel", "parallel", "arbitrary"),
            vmem_limit_bytes=VMEM_LIMIT),
    )(_pad2(a, Mp, Kp), _pad2(wa, Kp, Np), _pad2(ba.reshape(1, N), 1, Np),
      _pad2(wg, Kp, Np), _pad2(bg.reshape(1, N), 1, Np))
    if Mp != M or Np != N:
        out = out[:M, :N]
    return out


# ----------------------------------------------------------------------------
# Flash attention (merged-head layout, KV-tiled online softmax)
# ----------------------------------------------------------------------------
def _flash_attn_kernel(q_ref, k_ref, v_ref, o_ref, m_sc, l_sc, acc_sc, *,
                       scale, n_heads, s_len, ts):
    si = pl.program_id(2)

    @pl.when(si == 0)
    def _():
        m_sc[...] = jnp.full_like(m_sc, -1e30)
        l_sc[...] = jnp.zeros_like(l_sc)
        acc_sc[...] = jnp.zeros_like(acc_sc)

    q = q_ref[0]
    k = k_ref[0]
    v = v_ref[0]
    dh = q.shape[-1] // n_heads

    kv_pos = si * ts + jax.lax.broadcasted_iota(jnp.int32, (1, ts), 1)
    kv_valid = kv_pos < s_len                                  # mask padded KV rows

    for h in range(n_heads):
        sl = slice(h * dh, (h + 1) * dh)
        qh = q[:, sl].astype(jnp.bfloat16)
        kh = k[:, sl].astype(jnp.bfloat16)
        vh = v[:, sl].astype(jnp.bfloat16)
        s = jax.lax.dot_general(qh, kh, (((1,), (1,)), ((), ())),
                                preferred_element_type=jnp.float32) * scale
        s = jnp.where(kv_valid, s, -1e30)
        m_prev = m_sc[:, h:h + 1]
        l_prev = l_sc[:, h:h + 1]
        m_new = jnp.maximum(m_prev, jnp.max(s, axis=-1, keepdims=True))
        alpha = jnp.exp(m_prev - m_new)
        p = jnp.exp(s - m_new)
        l_sc[:, h:h + 1] = alpha * l_prev + jnp.sum(p, axis=-1, keepdims=True)
        acc_sc[:, sl] = alpha * acc_sc[:, sl] + jax.lax.dot_general(
            p.astype(jnp.bfloat16), vh, (((1,), (0,)), ((), ())),
            preferred_element_type=jnp.float32)
        m_sc[:, h:h + 1] = m_new

    @pl.when(si == pl.num_programs(2) - 1)
    def _():
        inv = pl.reciprocal(l_sc[...], approx=True)            # (tq, n_heads)
        outs = [acc_sc[:, h * dh:(h + 1) * dh] * inv[:, h:h + 1]
                for h in range(n_heads)]
        o_ref[0] = jnp.concatenate(outs, axis=-1).astype(o_ref.dtype)


@functools.partial(jax.jit, static_argnames=('n_heads',))
def flash_attention(q, k, v, *, n_heads):
    """softmax(q k^T / sqrt(Dh)) v on (B, T, C) / (B, S, C) merged-head tensors."""
    B, T, C = q.shape
    S = k.shape[1]
    dh = C // n_heads
    scale = 1.0 / math.sqrt(dh)

    tq = min(256, _round_up(T, 8))
    ts = min(512, _round_up(S, 8))
    Tp, Sp = _round_up(T, tq), _round_up(S, ts)
    q_p = _pad_rows3(q, Tp)
    k_p = _pad_rows3(k, Sp)
    v_p = _pad_rows3(v, Sp)

    out = pl.pallas_call(
        functools.partial(_flash_attn_kernel, scale=scale, n_heads=n_heads,
                          s_len=S, ts=ts),
        out_shape=jax.ShapeDtypeStruct((B, Tp, C), jnp.float32),
        grid=(B, Tp // tq, Sp // ts),
        in_specs=[pl.BlockSpec((1, tq, C), lambda b, qi, si: (b, qi, 0)),
                  pl.BlockSpec((1, ts, C), lambda b, qi, si: (b, si, 0)),
                  pl.BlockSpec((1, ts, C), lambda b, qi, si: (b, si, 0))],
        out_specs=pl.BlockSpec((1, tq, C), lambda b, qi, si: (b, qi, 0)),
        scratch_shapes=[pltpu.VMEM((tq, n_heads), jnp.float32),
                        pltpu.VMEM((tq, n_heads), jnp.float32),
                        pltpu.VMEM((tq, C), jnp.float32)],
        compiler_params=pltpu.CompilerParams(
            dimension_semantics=("parallel", "parallel", "arbitrary"),
            vmem_limit_bytes=VMEM_LIMIT),
    )(q_p, k_p, v_p)
    if Tp != T:
        out = out[:, :T, :]
    return out


# ----------------------------------------------------------------------------
# GroupNorm (2-stage: tiled stats reduce, then tiled scale/shift/SiLU apply)
# ----------------------------------------------------------------------------
def _gn_stats_kernel(x_ref, sum_ref, sq_ref):
    t = pl.program_id(1)
    x = x_ref[0]
    ps = jnp.sum(x, axis=0, keepdims=True)
    pq = jnp.sum(x * x, axis=0, keepdims=True)

    @pl.when(t == 0)
    def _():
        sum_ref[0] = jnp.zeros_like(sum_ref[0])
        sq_ref[0] = jnp.zeros_like(sq_ref[0])

    sum_ref[0] += ps
    sq_ref[0] += pq


def _gn_apply_kernel(x_ref, sc_ref, sh_ref, o_ref, *, silu):
    x = x_ref[0]
    y = x * sc_ref[0] + sh_ref[0]
    if silu:
        y = y * jax.nn.sigmoid(y)
    o_ref[0] = y.astype(o_ref.dtype)


@functools.partial(jax.jit, static_argnames=('num_groups', 'eps', 'silu'))
def group_norm(x, gamma, beta, *, num_groups=N_GROUPS, eps=1e-5, silu=False):
    B, H, W, C = x.shape
    G = num_groups
    Cg = C // G
    HW = H * W
    xt = x.reshape(B, HW, C)
    thw = min(256, _round_up(HW, 8))
    HWp = _round_up(HW, thw)
    xt = _pad_rows3(xt, HWp)

    sums, sqs = pl.pallas_call(
        _gn_stats_kernel,
        out_shape=(jax.ShapeDtypeStruct((B, 1, C), jnp.float32),
                   jax.ShapeDtypeStruct((B, 1, C), jnp.float32)),
        grid=(B, HWp // thw),
        in_specs=[pl.BlockSpec((1, thw, C), lambda b, t: (b, t, 0))],
        out_specs=(pl.BlockSpec((1, 1, C), lambda b, t: (b, 0, 0)),
                   pl.BlockSpec((1, 1, C), lambda b, t: (b, 0, 0))),
        compiler_params=pltpu.CompilerParams(
            dimension_semantics=("parallel", "arbitrary"),
            vmem_limit_bytes=VMEM_LIMIT),
    )(xt)

    cnt = float(HW * Cg)
    gsum = sums.reshape(B, G, Cg).sum(axis=-1)
    gsq = sqs.reshape(B, G, Cg).sum(axis=-1)
    mean = gsum / cnt
    var = jnp.maximum(gsq / cnt - mean * mean, 0.0)
    inv = jax.lax.rsqrt(var + eps)                          # (B, G)
    inv_c = jnp.repeat(inv, Cg, axis=1)                     # (B, C)
    mean_c = jnp.repeat(mean, Cg, axis=1)
    scale = inv_c * gamma[None, :]
    shift = beta[None, :] - mean_c * scale

    out = pl.pallas_call(
        functools.partial(_gn_apply_kernel, silu=silu),
        out_shape=jax.ShapeDtypeStruct((B, HWp, C), jnp.float32),
        grid=(B, HWp // thw),
        in_specs=[pl.BlockSpec((1, thw, C), lambda b, t: (b, t, 0)),
                  pl.BlockSpec((1, 1, C), lambda b, t: (b, 0, 0)),
                  pl.BlockSpec((1, 1, C), lambda b, t: (b, 0, 0))],
        out_specs=pl.BlockSpec((1, thw, C), lambda b, t: (b, t, 0)),
        compiler_params=pltpu.CompilerParams(
            dimension_semantics=("parallel", "parallel"),
            vmem_limit_bytes=VMEM_LIMIT),
    )(xt, scale.reshape(B, 1, C), shift.reshape(B, 1, C))
    if HWp != HW:
        out = out[:, :HW, :]
    return out.reshape(B, H, W, C)


# ----------------------------------------------------------------------------
# LayerNorm (tiled over tokens)
# ----------------------------------------------------------------------------
def _layernorm_kernel(x_ref, g_ref, b_ref, o_ref, *, eps):
    x = x_ref[0]
    mean = jnp.mean(x, axis=-1, keepdims=True)
    var = jnp.mean(jnp.square(x - mean), axis=-1, keepdims=True)
    y = (x - mean) * jax.lax.rsqrt(var + eps)
    o_ref[0] = (y * g_ref[...] + b_ref[...]).astype(o_ref.dtype)


@functools.partial(jax.jit, static_argnames=('eps',))
def layer_norm(x, gamma, beta, *, eps=1e-5):
    B, T, C = x.shape
    tt = min(256, _round_up(T, 8))
    Tp = _round_up(T, tt)
    xp = _pad_rows3(x, Tp)
    out = pl.pallas_call(
        functools.partial(_layernorm_kernel, eps=eps),
        out_shape=jax.ShapeDtypeStruct((B, Tp, C), jnp.float32),
        grid=(B, Tp // tt),
        in_specs=[pl.BlockSpec((1, tt, C), lambda b, t: (b, t, 0)),
                  pl.BlockSpec((1, C), lambda b, t: (0, 0)),
                  pl.BlockSpec((1, C), lambda b, t: (0, 0))],
        out_specs=pl.BlockSpec((1, tt, C), lambda b, t: (b, t, 0)),
        compiler_params=pltpu.CompilerParams(
            dimension_semantics=("parallel", "parallel"),
            vmem_limit_bytes=VMEM_LIMIT),
    )(xp, gamma.reshape(1, C), beta.reshape(1, C))
    if Tp != T:
        out = out[:, :T, :]
    return out


# ----------------------------------------------------------------------------
# Conv glue (NHWC, 1x1 = plain matmul; kxk via NHWC im2col feeding the MXU kernel)
# ----------------------------------------------------------------------------
def conv2d(x, w, b, *, stride=1, residual=None):
    B, H, W_, Cin = x.shape
    Cout, _, kh, kw = w.shape
    if kh == 1 and kw == 1 and stride == 1:
        a = x.reshape(B * H * W_, Cin)
        r = None if residual is None else residual.reshape(B * H * W_, Cout)
        out = matmul_bias(a, w.reshape(Cout, Cin).T, b, r)
        return out.reshape(B, H, W_, Cout)
    pad = kh // 2
    xp = jnp.pad(x, ((0, 0), (pad, pad), (pad, pad), (0, 0)))
    Ho = (H + 2 * pad - kh) // stride + 1
    Wo = (W_ + 2 * pad - kw) // stride + 1
    # TODO(synk): replace the XLA-side im2col below with tap-shifted BlockSpec indexing
    # (halo windows) so the 9x patch tensor is never materialised in HBM.
    cols = []
    for ki in range(kh):
        for kj in range(kw):
            cols.append(xp[:, ki:ki + (Ho - 1) * stride + 1:stride,
                           kj:kj + (Wo - 1) * stride + 1:stride, :])
    a = jnp.concatenate(cols, axis=-1).reshape(B * Ho * Wo, kh * kw * Cin)
    wm = jnp.transpose(w, (2, 3, 1, 0)).reshape(kh * kw * Cin, Cout)
    r = None if residual is None else residual.reshape(B * Ho * Wo, Cout)
    out = matmul_bias(a, wm, b, r)
    return out.reshape(B, Ho, Wo, Cout)


def upsample_nearest2x(x):
    return jnp.repeat(jnp.repeat(x, 2, axis=1), 2, axis=2)


# ----------------------------------------------------------------------------
# Blocks (mirror Unet_residualBlock / Unet_attentionBlock / UpSample)
# ----------------------------------------------------------------------------
def residual_block(p, x, time):
    residue = x
    if 'res_conv' in p:
        residue = conv2d(x, p['res_conv']['w'], p['res_conv']['b'])
    h = group_norm(x, p['gn_feat']['gamma'], p['gn_feat']['beta'], eps=1e-5, silu=True)
    t = matmul_bias(jax.nn.silu(time), p['lin_time']['w'], p['lin_time']['b'])   # (Bt, Cout)
    if t.shape[0] == 1:
        # fold the broadcast time-add into the conv bias (free epilogue)
        h = conv2d(h, p['conv_feat']['w'], p['conv_feat']['b'] + t[0])
    else:
        h = conv2d(h, p['conv_feat']['w'], p['conv_feat']['b'])
        h = h + t[:, None, None, :]
    h = group_norm(h, p['gn_merged']['gamma'], p['gn_merged']['beta'], eps=1e-5, silu=True)
    return conv2d(h, p['conv_merged']['w'], p['conv_merged']['b'], residual=residue)


def attention_block(p, x, context, n_heads=N_HEADS):
    B, H, W_, C = x.shape
    T = H * W_
    residue_long = x

    h = group_norm(x, p['gn']['gamma'], p['gn']['beta'], eps=1e-6, silu=False)
    h = conv2d(h, p['conv_in']['w'], p['conv_in']['b'])
    h = h.reshape(B, T, C)                                   # tokens: pure reshape in NHWC

    # --- self attention (residual fused into the output projection) ---
    res = h
    hn = layer_norm(h, p['ln1']['gamma'], p['ln1']['beta'])
    qkv = matmul_bias(hn.reshape(B * T, C), p['attn1_in']['w']).reshape(B, T, 3 * C)
    q, k, v = jnp.split(qkv, 3, axis=-1)
    o = flash_attention(q, k, v, n_heads=n_heads)
    h = matmul_bias(o.reshape(B * T, C), p['attn1_out']['w'], p['attn1_out']['b'],
                    res.reshape(B * T, C)).reshape(B, T, C)

    # --- cross attention ---
    res = h
    hn = layer_norm(h, p['ln2']['gamma'], p['ln2']['beta'])
    S, dctx = context.shape[1], context.shape[2]
    q = matmul_bias(hn.reshape(B * T, C), p['attn2_q']['w']).reshape(B, T, C)
    k = matmul_bias(context.reshape(B * S, dctx), p['attn2_k']['w']).reshape(B, S, C)
    v = matmul_bias(context.reshape(B * S, dctx), p['attn2_v']['w']).reshape(B, S, C)
    o = flash_attention(q, k, v, n_heads=n_heads)
    h = matmul_bias(o.reshape(B * T, C), p['attn2_out']['w'], p['attn2_out']['b'],
                    res.reshape(B * T, C)).reshape(B, T, C)

    # --- GEGLU feed-forward (geglu fused into geglu1; residual fused into geglu2) ---
    res = h
    hn = layer_norm(h, p['ln3']['gamma'], p['ln3']['beta'])
    n_ff = 4 * C
    hg = matmul_geglu(hn.reshape(B * T, C),
                      p['geglu1']['w'][:, :n_ff], p['geglu1']['b'][:n_ff],
                      p['geglu1']['w'][:, n_ff:], p['geglu1']['b'][n_ff:])
    h = matmul_bias(hg, p['geglu2']['w'], p['geglu2']['b'],
                    res.reshape(B * T, C)).reshape(B, T, C)

    # --- output 1x1 conv + long residual (fused) ---
    h = h.reshape(B, H, W_, C)
    return conv2d(h, p['conv_out']['w'], p['conv_out']['b'], residual=residue_long)


# ----------------------------------------------------------------------------
# UNet graph (mirror of Unet.__init__ with channel base = BASE)
# ----------------------------------------------------------------------------
def make_defs(b):
    enc = [
        [('conv', 4, b, 3, 1)],
        [('res', b, b), ('attn', b)],
        [('res', b, b), ('attn', b)],
        [('conv', b, b, 3, 2)],
        [('res', b, 2 * b), ('attn', 2 * b)],
        [('res', 2 * b, 2 * b), ('attn', 2 * b)],
        [('conv', 2 * b, 2 * b, 3, 2)],
        [('res', 2 * b, 4 * b), ('attn', 4 * b)],
        [('res', 4 * b, 4 * b), ('attn', 4 * b)],
        [('conv', 4 * b, 4 * b, 3, 2)],
        [('res', 4 * b, 4 * b)],
        [('res', 4 * b, 4 * b)],
    ]
    bot = [('res', 4 * b, 4 * b), ('attn', 4 * b), ('res', 4 * b, 4 * b)]
    dec = [
        [('res', 8 * b, 4 * b)],
        [('res', 8 * b, 4 * b)],
        [('res', 8 * b, 4 * b), ('up', 4 * b)],
        [('res', 8 * b, 4 * b), ('attn', 4 * b)],
        [('res', 8 * b, 4 * b), ('attn', 4 * b)],
        [('res', 6 * b, 4 * b), ('attn', 4 * b), ('up', 4 * b)],
        [('res', 6 * b, 2 * b), ('attn', 2 * b)],
        [('res', 4 * b, 2 * b), ('attn', 2 * b)],
        [('res', 3 * b, 2 * b), ('attn', 2 * b), ('up', 2 * b)],
        [('res', 3 * b, b), ('attn', b)],
        [('res', 2 * b, b), ('attn', b)],
        [('res', 2 * b, b), ('attn', b)],
    ]
    return enc, bot, dec


def _w(key, shape, scale=0.02):
    return scale * jax.random.normal(key, shape, jnp.float32)


def dense_params(key, k, n, bias=True):
    p = {'w': _w(key, (k, n))}
    if bias:
        p['b'] = jnp.zeros((n,), jnp.float32)
    return p


def conv_params(key, cout, cin, ksz):
    return {'w': _w(key, (cout, cin, ksz, ksz)), 'b': jnp.zeros((cout,), jnp.float32)}


def gn_params(c):
    return {'gamma': jnp.ones((c,), jnp.float32), 'beta': jnp.zeros((c,), jnp.float32)}


def init_residual_block(key, cin, cout, d_time):
    ks = jax.random.split(key, 4)
    p = {'gn_feat': gn_params(cin),
         'conv_feat': conv_params(ks[0], cout, cin, 3),
         'lin_time': dense_params(ks[1], d_time, cout),
         'gn_merged': gn_params(cout),
         'conv_merged': conv_params(ks[2], cout, cout, 3)}
    if cin != cout:
        p['res_conv'] = conv_params(ks[3], cout, cin, 1)
    return p


def init_attention_block(key, channels, d_context):
    ks = jax.random.split(key, 10)
    return {
        'gn': gn_params(channels),
        'conv_in': conv_params(ks[0], channels, channels, 1),
        'ln1': gn_params(channels),
        'attn1_in': {'w': _w(ks[1], (channels, 3 * channels))},
        'attn1_out': dense_params(ks[2], channels, channels),
        'ln2': gn_params(channels),
        'attn2_q': {'w': _w(ks[3], (channels, channels))},
        'attn2_k': {'w': _w(ks[4], (d_context, channels))},
        'attn2_v': {'w': _w(ks[5], (d_context, channels))},
        'attn2_out': dense_params(ks[6], channels, channels),
        'ln3': gn_params(channels),
        'geglu1': dense_params(ks[7], channels, 4 * channels * 2),
        'geglu2': dense_params(ks[8], 4 * channels, channels),
        'conv_out': conv_params(ks[9], channels, channels, 1),
    }


def init_unet_params(key):
    enc_defs, bot_defs, dec_defs = make_defs(BASE)
    keys = iter(jax.random.split(key, 256))

    def init_layer(d):
        kind = d[0]
        if kind == 'conv':
            return conv_params(next(keys), d[2], d[1], d[3])
        if kind == 'res':
            return init_residual_block(next(keys), d[1], d[2], D_TIME)
        if kind == 'attn':
            return init_attention_block(next(keys), d[1], D_CONTEXT)
        if kind == 'up':
            return conv_params(next(keys), d[1], d[1], 3)
        raise ValueError(kind)

    params = {
        'enc': [[init_layer(d) for d in seq] for seq in enc_defs],
        'bot': [init_layer(d) for d in bot_defs],
        'dec': [[init_layer(d) for d in seq] for seq in dec_defs],
    }
    return params, (enc_defs, bot_defs, dec_defs)


def apply_seq(defs, params, x, context, time):
    for d, p in zip(defs, params):
        kind = d[0]
        if kind == 'conv':
            x = conv2d(x, p['w'], p['b'], stride=d[4])
        elif kind == 'res':
            x = residual_block(p, x, time)
        elif kind == 'attn':
            x = attention_block(p, x, context)
        elif kind == 'up':
            x = upsample_nearest2x(x)
            x = conv2d(x, p['w'], p['b'], stride=1)
    return x


def unet_forward(params, defs, x, context, time):
    """x: NCHW (PyTorch convention); internally channels-last NHWC end-to-end."""
    enc_defs, bot_defs, dec_defs = defs
    x = jnp.transpose(x, (0, 2, 3, 1))                       # single NCHW->NHWC at entry
    skips = []
    for d, p in zip(enc_defs, params['enc']):
        x = apply_seq(d, p, x, context, time)
        skips.append(x)
    x = apply_seq(bot_defs, params['bot'], x, context, time)
    for d, p in zip(dec_defs, params['dec']):
        x = jnp.concatenate([x, skips.pop()], axis=-1)       # channel concat (last axis)
        x = apply_seq(d, p, x, context, time)
    return jnp.transpose(x, (0, 3, 1, 2))                    # back to NCHW at exit


# ----------------------------------------------------------------------------
if __name__ == "__main__":
    key = jax.random.PRNGKey(0)
    kp, kx, kc, kt = jax.random.split(key, 4)
    params, defs = init_unet_params(kp)

    B, H, W = 1, 16, 16
    x = jax.random.normal(kx, (B, 4, H, W), jnp.float32)
    context = jax.random.normal(kc, (B, 8, D_CONTEXT), jnp.float32)
    time = jax.random.normal(kt, (1, D_TIME), jnp.float32)

    out = unet_forward(params, defs, x, context, time)
    out = jax.block_until_ready(out)

    assert out.shape == (B, BASE, H, W), out.shape
    assert bool(jnp.all(jnp.isfinite(out)))
    print("KERNEL_OK")
</pallas_src>

<mosaic_0001>
module attributes {stable_mosaic.version = 11 : i64} {
  func.func @_matmul_kernel(%arg0: i32, %arg1: i32, %arg2: i32, %arg3: memref<256x128xf32, #tpu.memory_space<vmem>>, %arg4: memref<128x128xf32, #tpu.memory_space<vmem>>, %arg5: memref<1x128xf32, #tpu.memory_space<vmem>>, %arg6: memref<256x128xf32, #tpu.memory_space<vmem>>, %arg7: memref<256x128xf32, #tpu.memory_space<vmem>>) attributes {dimension_semantics = [#tpu.dimension_semantics<parallel>, #tpu.dimension_semantics<parallel>, #tpu.dimension_semantics<arbitrary>], iteration_bounds = array<i64: 1, 1, 1>, scalar_prefetch = 0 : i64, scratch_operands = 1 : i64, tpu.core_type = #tpu.core_type<tc>, window_params = [{transform_indices = @transform_0, window_bounds = array<i64: 256, 128>}, {transform_indices = @transform_1, window_bounds = array<i64: 128, 128>}, {transform_indices = @transform_2, window_bounds = array<i64: 1, 128>}, {transform_indices = @transform_3, window_bounds = array<i64: 256, 128>}]} {
    %c0_i32 = arith.constant 0 : i32
    %0 = arith.cmpi eq, %arg2, %c0_i32 : i32
    %1 = arith.extui %0 : i1 to i32
    %c0_i32_0 = arith.constant 0 : i32
    %2 = arith.cmpi ne, %1, %c0_i32_0 : i32
    scf.if %2 {
      %cst_10 = arith.constant 0.000000e+00 : f32
      %14 = vector.broadcast %cst_10 : f32 to vector<256x128xf32>
      %c0_11 = arith.constant 0 : index
      %c0_12 = arith.constant 0 : index
      %15 = vector.load %arg7[%c0_11, %c0_12] : memref<256x128xf32, #tpu.memory_space<vmem>>, vector<256x128xf32>
      tpu.vector_store %arg7[%c0_11, %c0_12], %14 {strides = array<i32>} : memref<256x128xf32, #tpu.memory_space<vmem>>, vector<256x128xf32>,
    } else {
    }
    %c0 = arith.constant 0 : index
    %c0_1 = arith.constant 0 : index
    %3 = vector.load %arg7[%c0, %c0_1] : memref<256x128xf32, #tpu.memory_space<vmem>>, vector<256x128xf32>
    %c0_2 = arith.constant 0 : index
    %c0_3 = arith.constant 0 : index
    %4 = vector.load %arg3[%c0_2, %c0_3] : memref<256x128xf32, #tpu.memory_space<vmem>>, vector<256x128xf32>
    %5 = arith.truncf %4 : vector<256x128xf32> to vector<256x128xbf16>
    %c0_4 = arith.constant 0 : index
    %c0_5 = arith.constant 0 : index
    %6 = vector.load %arg4[%c0_4, %c0_5] : memref<128x128xf32, #tpu.memory_space<vmem>>, vector<128x128xf32>
    %7 = arith.truncf %6 : vector<128x128xf32> to vector<128x128xbf16>
    %cst = arith.constant dense<0.000000e+00> : vector<256x128xf32>
    %8 = tpu.matmul %5, %7, %cst {dimension_numbers = #tpu.dot_dimension_numbers<[1], [0], [0], [1], [0, 0, 1, 1], [], []>} : vector<256x128xbf16>, vector<128x128xbf16>, vector<256x128xf32> -> vector<256x128xf32>
    %9 = arith.addf %3, %8 : vector<256x128xf32>
    %c0_6 = arith.constant 0 : index
    %c0_7 = arith.constant 0 : index
    %10 = vector.load %arg7[%c0_6, %c0_7] : memref<256x128xf32, #tpu.memory_space<vmem>>, vector<256x128xf32>
    tpu.vector_store %arg7[%c0_6, %c0_7], %9 {strides = array<i32>} : memref<256x128xf32, #tpu.memory_space<vmem>>, vector<256x128xf32>,
    %c0_i32_8 = arith.constant 0 : i32
    %11 = arith.cmpi eq, %arg2, %c0_i32_8 : i32
    %12 = arith.extui %11 : i1 to i32
    %c0_i32_9 = arith.constant 0 : i32
    %13 = arith.cmpi ne, %12, %c0_i32_9 : i32
    scf.if %13 {
      %c0_10 = arith.constant 0 : index
      %c0_11 = arith.constant 0 : index
      %14 = vector.load %arg7[%c0_10, %c0_11] : memref<256x128xf32, #tpu.memory_space<vmem>>, vector<256x128xf32>
      %c0_12 = arith.constant 0 : index
      %c0_13 = arith.constant 0 : index
      %15 = vector.load %arg5[%c0_12, %c0_13] : memref<1x128xf32, #tpu.memory_space<vmem>>, vector<1x128xf32>
      %16 = vector.broadcast %15 : vector<1x128xf32> to vector<256x128xf32>
      %17 = arith.addf %14, %16 : vector<256x128xf32>
      %c0_14 = arith.constant 0 : index
      %c0_15 = arith.constant 0 : index
      %18 = vector.load %arg6[%c0_14, %c0_15] : memref<256x128xf32, #tpu.memory_space<vmem>>, vector<256x128xf32>
      tpu.vector_store %arg6[%c0_14, %c0_15], %17 {strides = array<i32>} : memref<256x128xf32, #tpu.memory_space<vmem>>, vector<256x128xf32>,
    } else {
    }
    return
  }
  func.func @transform_0(%arg0: i32, %arg1: i32, %arg2: i32) -> (i32, i32) {
    %c0_i32 = arith.constant 0 : i32
    return %arg0, %arg2 : i32, i32
  }
  func.func @transform_1(%arg0: i32, %arg1: i32, %arg2: i32) -> (i32, i32) {
    %c0_i32 = arith.constant 0 : i32
    return %arg2, %arg1 : i32, i32
  }
  func.func @transform_2(%arg0: i32, %arg1: i32, %arg2: i32) -> (i32, i32) {
    %c0_i32 = arith.constant 0 : i32
    %c0_i32_0 = arith.constant 0 : i32
    return %c0_i32, %arg1 : i32, i32
  }
  func.func @transform_3(%arg0: i32, %arg1: i32, %arg2: i32) -> (i32, i32) {
    %c0_i32 = arith.constant 0 : i32
    return %arg0, %arg1 : i32, i32
  }
}

</mosaic_0001>

<bundles_post_ra>
// kernel: matmul_bias.1
= control target key start
LH: loop header
LB: loop body
LE: loop exit
PB: predicated region body
PF: predicated region fallthrough
CT: control target
= control target key end

     0   :  { %s876_s1 = inlined_call_operand.vmem [shape: f32[128,128], index: 1, kind: input, shape index: {}]   ;;  %s877_s0 = inlined_call_operand.vmem [shape: f32[256,128], index: 0, kind: input, shape index: {}]   ;;  %s878_s2 = inlined_call_operand.vmem [shape: f32[1,128], index: 2, kind: input, shape index: {}]   ;;  %s879_s3 = inlined_call_operand.vmem [shape: f32[256,128], index: 3, kind: output, shape index: {}]  }
   0x1   :  { %v131_v0 = vld [vmem:[%s876_s1] sm:$0xff]  ;;  %v132_v1 = vld [vmem:[%s876_s1 + $0x8] sm:$0xff]  ;;  %v133_v2 = vld [vmem:[%s876_s1 + $0x10] sm:$0xff] }
   0x2   :  { %v147_v3 = vpack.c.bf16 %v132_v1, %v131_v0  ;;  %v134_v4 = vld [vmem:[%s876_s1 + $0x18] sm:$0xff]  ;;  %v135_v6 = vld [vmem:[%s876_s1 + $0x20] sm:$0xff]  ;;  %v136_v7 = vld [vmem:[%s876_s1 + $0x28] sm:$0xff] }
   0x3   :  { %v148_v5 = vpack.c.bf16 %v134_v4, %v133_v2  ;;  %v149_v8 = vpack.c.bf16 %v136_v7, %v135_v6  ;;  %v137_v9 = vld [vmem:[%s876_s1 + $0x30] sm:$0xff]  ;;  %v83_v10 = vld [vmem:[%s877_s0] sm:$0xff]  ;;  %v84_v11 = vld [vmem:[%s877_s0 + $0x8] sm:$0xff] }
   0x4   :  { %515 = vmatprep.subr.bf16.mxu0 %v147_v3  ;;  %563 = vmatprep.subr.bf16.mxu1 %v147_v3  ;;  %v138_v12 = vld [vmem:[%s876_s1 + $0x38] sm:$0xff]  ;;  %v115_v13 = vpack.c.bf16 %v84_v11, %v83_v10  ;;  %v99_v14 = vld [vmem:[%s877_s0 + $0x80] sm:$0xff]  ;;  %v100_v15 = vld [vmem:[%s877_s0 + $0x88] sm:$0xff] }
   0x5   :  { %516 = vmatpush3.bf16.msra.mxu0 %v147_v3  ;;  %571 = vmatpush3.bf16.msra.mxu1 %v147_v3  ;;  %v123_v16 = vpack.c.bf16 %v100_v15, %v99_v14  ;;  %v150_v17 = vpack.c.bf16 %v138_v12, %v137_v9  ;;  %v139_v18 = vld [vmem:[%s876_s1 + $0x40] sm:$0xff]  ;;  %v140_v19 = vld [vmem:[%s876_s1 + $0x48] sm:$0xff]  ;;  %v141_v21 = vld [vmem:[%s876_s1 + $0x50] sm:$0xff] }
   0x6   :  { %517 = vmatprep.subr.bf16.mxu0 %v148_v5  ;;  %564 = vmatprep.subr.bf16.mxu1 %v148_v5  ;;  %v151_v20 = vpack.c.bf16 %v140_v19, %v139_v18  ;;  %v142_v22 = vld [vmem:[%s876_s1 + $0x58] sm:$0xff]  ;;  %v143_v24 = vld [vmem:[%s876_s1 + $0x60] sm:$0xff]  ;;  %v144_v25 = vld [vmem:[%s876_s1 + $0x68] sm:$0xff] }
   0x7   :  { %531 = vmatprep.mubr.bf16.mxu0 %v115_v13  ;;  %547 = vmatprep.mubr.bf16.mxu1 %v123_v16  ;;  %v152_v23 = vpack.c.bf16 %v142_v22, %v141_v21  ;;  %v153_v26 = vpack.c.bf16 %v144_v25, %v143_v24  ;;  %v145_v27 = vld [vmem:[%s876_s1 + $0x70] sm:$0xff]  ;;  %v146_v28 = vld [vmem:[%s876_s1 + $0x78] sm:$0xff]  ;;  %v87_v34 = vld [vmem:[%s877_s0 + $0x20] sm:$0xff] }
   0x8   :  { %v154_v29 = vpack.c.bf16 %v146_v28, %v145_v27  ;;  %v85_v30 = vld [vmem:[%s877_s0 + $0x10] sm:$0xff]  ;;  %v86_v31 = vld [vmem:[%s877_s0 + $0x18] sm:$0xff]  ;;  %v88_v35 = vld [vmem:[%s877_s0 + $0x28] sm:$0xff] }
   0x9   :  { %518 = vmatpush3.bf16.msra.mxu0 %v148_v5  ;;  %572 = vmatpush3.bf16.msra.mxu1 %v148_v5  ;;  %v101_v32 = vld [vmem:[%s877_s0 + $0x90] sm:$0xff]  ;;  %v102_v33 = vld [vmem:[%s877_s0 + $0x98] sm:$0xff]  ;;  %v103_v36 = vld [vmem:[%s877_s0 + $0xa0] sm:$0xff]  ;;  %v116_v38 = vpack.c.bf16 %v86_v31, %v85_v30  ;;  %v117_v40 = vpack.c.bf16 %v88_v35, %v87_v34 }
   0xa   :  { %519 = vmatprep.subr.bf16.mxu0 %v149_v8  ;;  %565 = vmatprep.subr.bf16.mxu1 %v149_v8  ;;  %v104_v37 = vld [vmem:[%s877_s0 + $0xa8] sm:$0xff]  ;;  %v124_v39 = vpack.c.bf16 %v102_v33, %v101_v32  ;;  %v89_v42 = vld [vmem:[%s877_s0 + $0x30] sm:$0xff]  ;;  %v90_v43 = vld [vmem:[%s877_s0 + $0x38] sm:$0xff] }
   0xb   :  { %v125_v41 = vpack.c.bf16 %v104_v37, %v103_v36  ;;  %v105_v44 = vld [vmem:[%s877_s0 + $0xb0] sm:$0xff]  ;;  %v106_v45 = vld [vmem:[%s877_s0 + $0xb8] sm:$0xff]  ;;  %v91_v46 = vld [vmem:[%s877_s0 + $0x40] sm:$0xff]  ;;  %v118_v50 = vpack.c.bf16 %v90_v43, %v89_v42 }
   0xc   :  { %v92_v47 = vld [vmem:[%s877_s0 + $0x48] sm:$0xff]  ;;  %v107_v48 = vld [vmem:[%s877_s0 + $0xc0] sm:$0xff]  ;;  %v126_v51 = vpack.c.bf16 %v106_v45, %v105_v44  ;;  %v93_v54 = vld [vmem:[%s877_s0 + $0x50] sm:$0xff] }
   0xd   :  { %520 = vmatpush3.bf16.msra.mxu0 %v149_v8  ;;  %573 = vmatpush3.bf16.msra.mxu1 %v149_v8  ;;  %v108_v49 = vld [vmem:[%s877_s0 + $0xc8] sm:$0xff]  ;;  %v119_v52 = vpack.c.bf16 %v92_v47, %v91_v46  ;;  %v94_v55 = vld [vmem:[%s877_s0 + $0x58] sm:$0xff]  ;;  %v109_v56 = vld [vmem:[%s877_s0 + $0xd0] sm:$0xff] }
   0xe   :  { %521 = vmatprep.subr.bf16.mxu0 %v150_v17  ;;  %566 = vmatprep.subr.bf16.mxu1 %v150_v17  ;;  %v127_v53 = vpack.c.bf16 %v108_v49, %v107_v48  ;;  %v110_v57 = vld [vmem:[%s877_s0 + $0xd8] sm:$0xff]  ;;  %v95_v58 = vld [vmem:[%s877_s0 + $0x60] sm:$0xff]  ;;  %v96_v59 = vld [vmem:[%s877_s0 + $0x68] sm:$0xff]  ;;  %v120_v62 = vpack.c.bf16 %v94_v55, %v93_v54 }
   0xf   :  { %v111_v60 = vld [vmem:[%s877_s0 + $0xe0] sm:$0xff]  ;;  %v112_v61 = vld [vmem:[%s877_s0 + $0xe8] sm:$0xff]  ;;  %v128_v63 = vpack.c.bf16 %v110_v57, %v109_v56  ;;  %v121_v0 = vpack.c.bf16 %v96_v59, %v95_v58  ;;  %v97_v2 = vld [vmem:[%s877_s0 + $0x70] sm:$0xff] }
  0x10   :  { %v129_v1 = vpack.c.bf16 %v112_v61, %v111_v60  ;;  %v98_v3 = vld [vmem:[%s877_s0 + $0x78] sm:$0xff]  ;;  %v113_v4 = vld [vmem:[%s877_s0 + $0xf0] sm:$0xff]  ;;  %v746_v8 = vld [vmem:[%s878_s2] ss:$0 sm:$0xff] }
  0x11   :  { %522 = vmatpush3.bf16.msra.mxu0 %v150_v17  ;;  %574 = vmatpush3.bf16.msra.mxu1 %v150_v17  ;;  %v114_v5 = vld [vmem:[%s877_s0 + $0xf8] sm:$0xff]  ;;  %v122_v6 = vpack.c.bf16 %v98_v3, %v97_v2 }
  0x12   :  { %523 = vmatprep.subr.bf16.mxu0 %v151_v20  ;;  %567 = vmatprep.subr.bf16.mxu1 %v151_v20  ;;  %v130_v7 = vpack.c.bf16 %v114_v5, %v113_v4 }
  0x15   :  { %524 = vmatpush3.bf16.msra.mxu0 %v151_v20  ;;  %575 = vmatpush3.bf16.msra.mxu1 %v151_v20 }
  0x16   :  { %525 = vmatprep.subr.bf16.mxu0 %v152_v23  ;;  %568 = vmatprep.subr.bf16.mxu1 %v152_v23 }
  0x19   :  { %526 = vmatpush3.bf16.msra.mxu0 %v152_v23  ;;  %576 = vmatpush3.bf16.msra.mxu1 %v152_v23 }
  0x1a   :  { %527 = vmatprep.subr.bf16.mxu0 %v153_v26  ;;  %569 = vmatprep.subr.bf16.mxu1 %v153_v26 }
  0x1d   :  { %528 = vmatpush3.bf16.msra.mxu0 %v153_v26  ;;  %577 = vmatpush3.bf16.msra.mxu1 %v153_v26 }
  0x1e   :  { %529 = vmatprep.subr.bf16.mxu0 %v154_v29  ;;  %570 = vmatprep.subr.bf16.mxu1 %v154_v29 }
  0x21   :  { %530 = vmatpush3.bf16.msra.mxu0 %v154_v29  ;;  %578 = vmatpush3.bf16.msra.mxu1 %v154_v29 }
  0x24   :  { %532 = vmatmul.mubr.bf16.vlgmr.msra.gmra.mrb[0].mxu0 %v116_v38  ;;  %548 = vmatmul.mubr.bf16.vlgmr.msra.gmra.mrb[0].mxu1 %v124_v39 }
  0x25   :  { %535 = vmatprep.mubr.bf16.mxu0 %v117_v40  ;;  %551 = vmatprep.mubr.bf16.mxu1 %v125_v41 }
  0x2c   :  { %536 = vmatmul.mubr.bf16.gmra.mrb[4].mxu0 %v118_v50  ;;  %552 = vmatmul.mubr.bf16.gmra.mrb[4].mxu1 %v126_v51 }
  0x2d   :  { %539 = vmatprep.mubr.bf16.mxu0 %v119_v52  ;;  %555 = vmatprep.mubr.bf16.mxu1 %v127_v53 }
  0x34   :  { %540 = vmatmul.mubr.bf16.gmra.mrb[8].mxu0 %v120_v62  ;;  %556 = vmatmul.mubr.bf16.gmra.mrb[8].mxu1 %v128_v63 }
  0x35   :  { %543 = vmatprep.mubr.bf16.mxu0 %v121_v0  ;;  %559 = vmatprep.mubr.bf16.mxu1 %v129_v1 }
  0x3c   :  { %544 = vmatmul.mubr.bf16.gmra.mrb[12].mxu0 %v122_v6  ;;  %560 = vmatmul.mubr.bf16.gmra.mrb[12].mxu1 %v130_v7 }
  0xf7   :  { %v533_v9 = vpop.f32.mrb[0].mxu0  ;;  %v549_v10 = vpop.f32.mrb[0].mxu1 }
  0xf8   :  { %v424_v11 = vadd.f32 %v533_v9, %v746_v8  ;;  %v440_v12 = vadd.f32 %v549_v10, %v746_v8  ;;  %v189_v13 = vpop.f32.mrb[1].mxu0  ;;  %v253_v14 = vpop.f32.mrb[1].mxu1 }
  0xf9   :  { %v422_v15 = vadd.f32 %v746_v8, %v189_v13  ;;  %v438_v16 = vadd.f32 %v746_v8, %v253_v14  ;;  %v534_v17 = vpop.f32.mrb[2].mxu0  ;;  %v550_v18 = vpop.f32.mrb[2].mxu1 }
  0xfa   :  { %456 = vst [vmem:[%s879_s3 + $0x10] sm:$0xff] %v424_v11  ;;  %472 = vst [vmem:[%s879_s3 + $0x90] sm:$0xff] %v440_v12  ;;  %v425_v19 = vadd.f32 %v534_v17, %v746_v8  ;;  %v441_v20 = vadd.f32 %v550_v18, %v746_v8  ;;  %v192_v21 = vpop.f32.mrb[3].mxu0  ;;  %v256_v22 = vpop.f32.mrb[3].mxu1 }
  0xfb   :  { %454 = vst [vmem:[%s879_s3] sm:$0xff] %v422_v15  ;;  %470 = vst [vmem:[%s879_s3 + $0x80] sm:$0xff] %v438_v16  ;;  %v423_v23 = vadd.f32 %v746_v8, %v192_v21  ;;  %v439_v24 = vadd.f32 %v746_v8, %v256_v22 }
  0xfc   :  { %457 = vst [vmem:[%s879_s3 + $0x18] sm:$0xff] %v425_v19  ;;  %473 = vst [vmem:[%s879_s3 + $0x98] sm:$0xff] %v441_v20 }
  0xfd   :  { %455 = vst [vmem:[%s879_s3 + $0x8] sm:$0xff] %v423_v23  ;;  %471 = vst [vmem:[%s879_s3 + $0x88] sm:$0xff] %v439_v24 }
  0xff   :  { %v537_v25 = vpop.f32.mrb[4].mxu0  ;;  %v553_v26 = vpop.f32.mrb[4].mxu1 }
 0x100   :  { %v428_v27 = vadd.f32 %v537_v25, %v746_v8  ;;  %v444_v28 = vadd.f32 %v553_v26, %v746_v8  ;;  %v205_v29 = vpop.f32.mrb[5].mxu0  ;;  %v269_v30 = vpop.f32.mrb[5].mxu1 }
 0x101   :  { %v426_v31 = vadd.f32 %v746_v8, %v205_v29  ;;  %v442_v32 = vadd.f32 %v746_v8, %v269_v30  ;;  %v538_v33 = vpop.f32.mrb[6].mxu0  ;;  %v554_v34 = vpop.f32.mrb[6].mxu1 }
 0x102   :  { %460 = vst [vmem:[%s879_s3 + $0x30] sm:$0xff] %v428_v27  ;;  %476 = vst [vmem:[%s879_s3 + $0xb0] sm:$0xff] %v444_v28  ;;  %v429_v35 = vadd.f32 %v538_v33, %v746_v8  ;;  %v445_v36 = vadd.f32 %v554_v34, %v746_v8  ;;  %v208_v37 = vpop.f32.mrb[7].mxu0  ;;  %v272_v38 = vpop.f32.mrb[7].mxu1 }
 0x103   :  { %458 = vst [vmem:[%s879_s3 + $0x20] sm:$0xff] %v426_v31  ;;  %474 = vst [vmem:[%s879_s3 + $0xa0] sm:$0xff] %v442_v32  ;;  %v427_v39 = vadd.f32 %v746_v8, %v208_v37  ;;  %v443_v40 = vadd.f32 %v746_v8, %v272_v38 }
 0x104   :  { %461 = vst [vmem:[%s879_s3 + $0x38] sm:$0xff] %v429_v35  ;;  %477 = vst [vmem:[%s879_s3 + $0xb8] sm:$0xff] %v445_v36 }
 0x105   :  { %459 = vst [vmem:[%s879_s3 + $0x28] sm:$0xff] %v427_v39  ;;  %475 = vst [vmem:[%s879_s3 + $0xa8] sm:$0xff] %v443_v40 }
 0x107   :  { %v541_v41 = vpop.f32.mrb[8].mxu0  ;;  %v557_v42 = vpop.f32.mrb[8].mxu1 }
 0x108   :  { %v432_v43 = vadd.f32 %v541_v41, %v746_v8  ;;  %v448_v44 = vadd.f32 %v557_v42, %v746_v8  ;;  %v221_v45 = vpop.f32.mrb[9].mxu0  ;;  %v285_v46 = vpop.f32.mrb[9].mxu1 }
 0x109   :  { %v430_v47 = vadd.f32 %v746_v8, %v221_v45  ;;  %v446_v48 = vadd.f32 %v746_v8, %v285_v46  ;;  %v542_v49 = vpop.f32.mrb[10].mxu0  ;;  %v558_v50 = vpop.f32.mrb[10].mxu1 }
 0x10a   :  { %464 = vst [vmem:[%s879_s3 + $0x50] sm:$0xff] %v432_v43  ;;  %480 = vst [vmem:[%s879_s3 + $0xd0] sm:$0xff] %v448_v44  ;;  %v433_v51 = vadd.f32 %v542_v49, %v746_v8  ;;  %v449_v52 = vadd.f32 %v558_v50, %v746_v8  ;;  %v224_v53 = vpop.f32.mrb[11].mxu0  ;;  %v288_v54 = vpop.f32.mrb[11].mxu1 }
 0x10b   :  { %462 = vst [vmem:[%s879_s3 + $0x40] sm:$0xff] %v430_v47  ;;  %478 = vst [vmem:[%s879_s3 + $0xc0] sm:$0xff] %v446_v48  ;;  %v431_v55 = vadd.f32 %v746_v8, %v224_v53  ;;  %v447_v56 = vadd.f32 %v746_v8, %v288_v54 }
 0x10c   :  { %465 = vst [vmem:[%s879_s3 + $0x58] sm:$0xff] %v433_v51  ;;  %481 = vst [vmem:[%s879_s3 + $0xd8] sm:$0xff] %v449_v52 }
 0x10d   :  { %463 = vst [vmem:[%s879_s3 + $0x48] sm:$0xff] %v431_v55  ;;  %479 = vst [vmem:[%s879_s3 + $0xc8] sm:$0xff] %v447_v56 }
 0x10f   :  { %v545_v57 = vpop.f32.mrb[12].mxu0  ;;  %v561_v58 = vpop.f32.mrb[12].mxu1 }
 0x110   :  { %v436_v59 = vadd.f32 %v545_v57, %v746_v8  ;;  %v452_v60 = vadd.f32 %v561_v58, %v746_v8  ;;  %v237_v61 = vpop.f32.mrb[13].mxu0  ;;  %v301_v62 = vpop.f32.mrb[13].mxu1 }
 0x111   :  { %v434_v63 = vadd.f32 %v746_v8, %v237_v61  ;;  %v450_v0 = vadd.f32 %v746_v8, %v301_v62  ;;  %v546_v1 = vpop.f32.mrb[14].mxu0  ;;  %v562_v2 = vpop.f32.mrb[14].mxu1 }
 0x112   :  { %468 = vst [vmem:[%s879_s3 + $0x70] sm:$0xff] %v436_v59  ;;  %484 = vst [vmem:[%s879_s3 + $0xf0] sm:$0xff] %v452_v60  ;;  %v437_v3 = vadd.f32 %v546_v1, %v746_v8  ;;  %v453_v4 = vadd.f32 %v562_v2, %v746_v8  ;;  %v240_v5 = vpop.f32.mrb[15].mxu0  ;;  %v304_v6 = vpop.f32.mrb[15].mxu1 }
 0x113   :  { %466 = vst [vmem:[%s879_s3 + $0x60] sm:$0xff] %v434_v63  ;;  %482 = vst [vmem:[%s879_s3 + $0xe0] sm:$0xff] %v450_v0  ;;  %v435_v7 = vadd.f32 %v746_v8, %v240_v5  ;;  %v451_v9 = vadd.f32 %v746_v8, %v304_v6 }
 0x114   :  { %469 = vst [vmem:[%s879_s3 + $0x78] sm:$0xff] %v437_v3  ;;  %485 = vst [vmem:[%s879_s3 + $0xf8] sm:$0xff] %v453_v4 }
 0x115   :  { %467 = vst [vmem:[%s879_s3 + $0x68] sm:$0xff] %v435_v7  ;;  %483 = vst [vmem:[%s879_s3 + $0xe8] sm:$0xff] %v451_v9 }

</bundles_post_ra>
